<compile_context>
chip_gen: v7x
topology: tpu7x:2x2x1
jax: 0.10.0
libtpu: 0.0.40
codegen_flags: <defaults>
</compile_context>

<pallas_src>
import functools

import jax
import jax.numpy as jnp
from jax import lax
from jax.experimental import pallas as pl
from jax.experimental.pallas import tpu as pltpu


def _qnet_kernel(x_ref, w1_ref, b1_ref, w2_ref, b2_ref, w3_ref, b3_ref, o_ref):
    """One batch tile of the 3-layer MLP, hidden activations kept as (H, TB)."""
    # Layer 1: h1_t[j, b] = sum_d x[b, d] * w1[d, j]  ->  (H, TB), lane-dense.
    h1 = lax.dot_general(
        w1_ref[...], x_ref[...],
        dimension_numbers=(((0,), (1,)), ((), ())),
        preferred_element_type=jnp.float32)
    h1 = jnp.maximum(h1 + b1_ref[...], 0.0).astype(w2_ref.dtype)

    # Layer 2: h2_t[j, b] = sum_i h1_t[i, b] * w2[i, j]  ->  (H, TB).
    h2 = lax.dot_general(
        w2_ref[...], h1,
        dimension_numbers=(((0,), (0,)), ((), ())),
        preferred_element_type=jnp.float32)
    h2 = jnp.maximum(h2 + b2_ref[...], 0.0).astype(w3_ref.dtype)

    # Layer 3: q[0, b] = sum_j w3_row[0, j] * h2_t[j, b]  ->  (1, TB),
    # lane-dense store (batch on the lane axis).
    q = lax.dot_general(
        w3_ref[...], h2,
        dimension_numbers=(((1,), (0,)), ((), ())),
        preferred_element_type=jnp.float32)
    o_ref[...] = (q + b3_ref[...]).astype(o_ref.dtype)


def prepare_params(params, compute_dtype=jnp.float32):
    """One-time (per parameter update) weight preparation — hoisted off the hot path."""
    w1, b1, w2, b2, w3, b3 = params
    H = int(w2.shape[0])
    return {
        "w1": jnp.asarray(w1, compute_dtype),                 # (D, H)
        "b1": jnp.asarray(b1, jnp.float32).reshape(H, 1),     # (H, 1) column
        "w2": jnp.asarray(w2, compute_dtype),                 # (H, H)
        "b2": jnp.asarray(b2, jnp.float32).reshape(H, 1),     # (H, 1) column
        "w3": jnp.asarray(w3, compute_dtype).reshape(1, H),   # (1, H) row
        "b3": jnp.asarray(b3, jnp.float32).reshape(1, 1),     # (1, 1)
    }


def _round_up(x, m):
    return ((x + m - 1) // m) * m


@functools.partial(jax.jit, static_argnames=("use_domain_flag",))
def qnetwork_basic_forward(state, action, domain_parameter, prepared,
                           use_domain_flag=True):
    """Jitted Pallas forward for QNetworkBasic. Returns q of shape [B, 1] (f32)."""
    w1 = prepared["w1"]
    compute_dtype = w1.dtype
    D, H = int(w1.shape[0]), int(w1.shape[1])

    if use_domain_flag:
        pieces = [state, action, domain_parameter]
    else:
        pieces = [state, action]
    # Tiny (~D*4 bytes/row) concat, fused under jit; lets layer 1 be ONE dot
    # and the kernel stream a single lane-padded input buffer.
    x = jnp.concatenate(pieces, axis=-1).astype(compute_dtype)
    B = int(x.shape[0])
    assert int(x.shape[-1]) == D, "prepared params do not match input dims"

    # Batch tile: single block for small B; otherwise >=2 grid steps so the
    # "parallel" batch axis can be sharded across v7x's two TensorCores,
    # capped at 4096 rows to stay far under the scoped-VMEM limit.
    MAX_TILE = 4096
    if B < 256:
        TB = B
    else:
        TB = min(MAX_TILE, _round_up(pl.cdiv(B, 2), 128))
    n_tiles = pl.cdiv(B, TB)

    resident = lambda shape: pl.BlockSpec(shape, lambda i: (0, 0))
    in_specs = [
        pl.BlockSpec((TB, D), lambda i: (i, 0)),   # x tile (streamed)
        resident((D, H)),                          # W1
        resident((H, 1)),                          # b1
        resident((H, H)),                          # W2
        resident((H, 1)),                          # b2
        resident((1, H)),                          # W3 row
        resident((1, 1)),                          # b3
    ]
    out_spec = pl.BlockSpec((1, TB), lambda i: (0, i))

    q_row = pl.pallas_call(
        _qnet_kernel,
        out_shape=jax.ShapeDtypeStruct((1, B), jnp.float32),
        grid=(n_tiles,),
        in_specs=in_specs,
        out_specs=out_spec,
        compiler_params=pltpu.CompilerParams(
            dimension_semantics=("parallel",)),
    )(x, w1, prepared["b1"], prepared["w2"], prepared["b2"],
      prepared["w3"], prepared["b3"])

    # Layout plumbing only: lane-dense (1, B) row -> PyTorch's (B, 1) column.
    # (If the SAC loss can consume (1, B) / (B,), drop this reshape.)
    return q_row[0, :].reshape(B, 1)


def init_params(key, input_dim, hidden_num):
    """Deterministic synthetic parameters (PyTorch-Linear-like uniform init)."""
    ks = jax.random.split(key, 6)

    def uni(k, shape, fan_in):
        bound = 1.0 / jnp.sqrt(jnp.float32(fan_in))
        return jax.random.uniform(k, shape, jnp.float32, -bound, bound)

    w1 = uni(ks[0], (input_dim, hidden_num), input_dim)
    b1 = uni(ks[1], (hidden_num,), input_dim)
    w2 = uni(ks[2], (hidden_num, hidden_num), hidden_num)
    b2 = uni(ks[3], (hidden_num,), hidden_num)
    # linear3 uses linear_weights_init in the original module; synthetic small
    # uniform init here (no checkpoint is loaded).
    w3 = uni(ks[4], (hidden_num, 1), hidden_num) * 0.003
    b3 = uni(ks[5], (1,), hidden_num) * 0.003
    return (w1, b1, w2, b2, w3, b3)


if __name__ == "__main__":
    # Small shapes consistent with the module's forward.
    BATCH = 2
    STATE_DIM = 8
    ACTION_DIM = 4
    DOMAIN_PARAMETER_DIM = 3
    HIDDEN_NUM = 32
    USE_DOMAIN_FLAG = True

    input_dim = STATE_DIM + ACTION_DIM + (DOMAIN_PARAMETER_DIM if USE_DOMAIN_FLAG else 0)

    key = jax.random.PRNGKey(0)
    k_s, k_a, k_d, k_p = jax.random.split(key, 4)
    state = jax.random.normal(k_s, (BATCH, STATE_DIM), jnp.float32)
    action = jax.random.normal(k_a, (BATCH, ACTION_DIM), jnp.float32)
    domain_parameter = jax.random.normal(k_d, (BATCH, DOMAIN_PARAMETER_DIM), jnp.float32)

    params = init_params(k_p, input_dim, HIDDEN_NUM)
    # Hoisted off the hot path: do this once per parameter update.
    # (Use compute_dtype=jnp.bfloat16 on v6e/v7x for the MXU/HBM win.)
    prepared = prepare_params(params, compute_dtype=jnp.float32)

    q = qnetwork_basic_forward(state, action, domain_parameter, prepared,
                               use_domain_flag=USE_DOMAIN_FLAG)
    q = jax.block_until_ready(q)

    # Pure-JAX reference check of the same forward pass.
    x = jnp.concatenate([state, action, domain_parameter], axis=-1)
    w1, b1, w2, b2, w3, b3 = params
    h1 = jnp.maximum(x @ w1 + b1, 0.0)
    h2 = jnp.maximum(h1 @ w2 + b2, 0.0)
    q_ref = h2 @ w3 + b3
    assert q.shape == (BATCH, 1)
    assert jnp.allclose(q, q_ref, atol=1e-5, rtol=1e-5)

    print("KERNEL_OK")
</pallas_src>

<mosaic_0001>
module attributes {stable_mosaic.version = 11 : i64} {
  func.func @_qnet_kernel(%arg0: i32, %arg1: memref<2x15xf32, #tpu.memory_space<vmem>>, %arg2: memref<15x32xf32, #tpu.memory_space<vmem>>, %arg3: memref<32x1xf32, #tpu.memory_space<vmem>>, %arg4: memref<32x32xf32, #tpu.memory_space<vmem>>, %arg5: memref<32x1xf32, #tpu.memory_space<vmem>>, %arg6: memref<1x32xf32, #tpu.memory_space<vmem>>, %arg7: memref<1x1xf32, #tpu.memory_space<vmem>>, %arg8: memref<1x2xf32, #tpu.memory_space<vmem>>) attributes {dimension_semantics = [#tpu.dimension_semantics<parallel>], iteration_bounds = array<i64: 1>, scalar_prefetch = 0 : i64, scratch_operands = 0 : i64, tpu.core_type = #tpu.core_type<tc>, window_params = [{transform_indices = @transform_0, window_bounds = array<i64: 2, 15>}, {pipeline_mode = #tpu.pipeline_mode<synchronous>, transform_indices = @transform_1, window_bounds = array<i64: 15, 32>}, {pipeline_mode = #tpu.pipeline_mode<synchronous>, transform_indices = @transform_2, window_bounds = array<i64: 32, 1>}, {pipeline_mode = #tpu.pipeline_mode<synchronous>, transform_indices = @transform_3, window_bounds = array<i64: 32, 32>}, {pipeline_mode = #tpu.pipeline_mode<synchronous>, transform_indices = @transform_4, window_bounds = array<i64: 32, 1>}, {pipeline_mode = #tpu.pipeline_mode<synchronous>, transform_indices = @transform_5, window_bounds = array<i64: 1, 32>}, {pipeline_mode = #tpu.pipeline_mode<synchronous>, transform_indices = @transform_6, window_bounds = array<i64: 1, 1>}, {transform_indices = @transform_7, window_bounds = array<i64: 1, 2>}]} {
    %c0 = arith.constant 0 : index
    %c0_0 = arith.constant 0 : index
    %0 = vector.load %arg2[%c0, %c0_0] : memref<15x32xf32, #tpu.memory_space<vmem>>, vector<15x32xf32>
    %c0_1 = arith.constant 0 : index
    %c0_2 = arith.constant 0 : index
    %1 = vector.load %arg1[%c0_1, %c0_2] : memref<2x15xf32, #tpu.memory_space<vmem>>, vector<2x15xf32>
    %cst = arith.constant dense<0.000000e+00> : vector<32x2xf32>
    %2 = tpu.matmul %0, %1, %cst {dimension_numbers = #tpu.dot_dimension_numbers<[0], [1], [1], [0], [0, 1, 1, 0], [], []>} : vector<15x32xf32>, vector<2x15xf32>, vector<32x2xf32> -> vector<32x2xf32>
    %c0_3 = arith.constant 0 : index
    %c0_4 = arith.constant 0 : index
    %3 = vector.load %arg3[%c0_3, %c0_4] : memref<32x1xf32, #tpu.memory_space<vmem>>, vector<32x1xf32>
    %4 = vector.broadcast %3 : vector<32x1xf32> to vector<32x2xf32>
    %5 = arith.addf %2, %4 : vector<32x2xf32>
    %cst_5 = arith.constant 0.000000e+00 : f32
    %6 = vector.broadcast %cst_5 : f32 to vector<32x2xf32>
    %7 = arith.maximumf %5, %6 : vector<32x2xf32>
    %c0_6 = arith.constant 0 : index
    %c0_7 = arith.constant 0 : index
    %8 = vector.load %arg4[%c0_6, %c0_7] : memref<32x32xf32, #tpu.memory_space<vmem>>, vector<32x32xf32>
    %cst_8 = arith.constant dense<0.000000e+00> : vector<32x2xf32>
    %9 = tpu.matmul %8, %7, %cst_8 {dimension_numbers = #tpu.dot_dimension_numbers<[0], [0], [1], [1], [0, 1, 1, 1], [], []>} : vector<32x32xf32>, vector<32x2xf32>, vector<32x2xf32> -> vector<32x2xf32>
    %c0_9 = arith.constant 0 : index
    %c0_10 = arith.constant 0 : index
    %10 = vector.load %arg5[%c0_9, %c0_10] : memref<32x1xf32, #tpu.memory_space<vmem>>, vector<32x1xf32>
    %11 = vector.broadcast %10 : vector<32x1xf32> to vector<32x2xf32>
    %12 = arith.addf %9, %11 : vector<32x2xf32>
    %cst_11 = arith.constant 0.000000e+00 : f32
    %13 = vector.broadcast %cst_11 : f32 to vector<32x2xf32>
    %14 = arith.maximumf %12, %13 : vector<32x2xf32>
    %c0_12 = arith.constant 0 : index
    %c0_13 = arith.constant 0 : index
    %15 = vector.load %arg6[%c0_12, %c0_13] : memref<1x32xf32, #tpu.memory_space<vmem>>, vector<1x32xf32>
    %cst_14 = arith.constant dense<0.000000e+00> : vector<1x2xf32>
    %16 = tpu.matmul %15, %14, %cst_14 {dimension_numbers = #tpu.dot_dimension_numbers<[1], [0], [0], [1], [0, 0, 1, 1], [], []>} : vector<1x32xf32>, vector<32x2xf32>, vector<1x2xf32> -> vector<1x2xf32>
    %c0_15 = arith.constant 0 : index
    %c0_16 = arith.constant 0 : index
    %17 = vector.load %arg7[%c0_15, %c0_16] : memref<1x1xf32, #tpu.memory_space<vmem>>, vector<1x1xf32>
    %18 = vector.broadcast %17 : vector<1x1xf32> to vector<1x2xf32>
    %19 = arith.addf %16, %18 : vector<1x2xf32>
    %c0_17 = arith.constant 0 : index
    %c0_18 = arith.constant 0 : index
    %20 = vector.load %arg8[%c0_17, %c0_18] : memref<1x2xf32, #tpu.memory_space<vmem>>, vector<1x2xf32>
    tpu.vector_store %arg8[%c0_17, %c0_18], %19 {strides = array<i32>} : memref<1x2xf32, #tpu.memory_space<vmem>>, vector<1x2xf32>,
    return
  }
  func.func @transform_0(%arg0: i32) -> (i32, i32) {
    %c0_i32 = arith.constant 0 : i32
    %c0_i32_0 = arith.constant 0 : i32
    return %arg0, %c0_i32 : i32, i32
  }
  func.func @transform_1(%arg0: i32) -> (i32, i32) {
    %c0_i32 = arith.constant 0 : i32
    %c0_i32_0 = arith.constant 0 : i32
    %c0_i32_1 = arith.constant 0 : i32
    return %c0_i32, %c0_i32_0 : i32, i32
  }
  func.func @transform_2(%arg0: i32) -> (i32, i32) {
    %c0_i32 = arith.constant 0 : i32
    %c0_i32_0 = arith.constant 0 : i32
    %c0_i32_1 = arith.constant 0 : i32
    return %c0_i32, %c0_i32_0 : i32, i32
  }
  func.func @transform_3(%arg0: i32) -> (i32, i32) {
    %c0_i32 = arith.constant 0 : i32
    %c0_i32_0 = arith.constant 0 : i32
    %c0_i32_1 = arith.constant 0 : i32
    return %c0_i32, %c0_i32_0 : i32, i32
  }
  func.func @transform_4(%arg0: i32) -> (i32, i32) {
    %c0_i32 = arith.constant 0 : i32
    %c0_i32_0 = arith.constant 0 : i32
    %c0_i32_1 = arith.constant 0 : i32
    return %c0_i32, %c0_i32_0 : i32, i32
  }
  func.func @transform_5(%arg0: i32) -> (i32, i32) {
    %c0_i32 = arith.constant 0 : i32
    %c0_i32_0 = arith.constant 0 : i32
    %c0_i32_1 = arith.constant 0 : i32
    return %c0_i32, %c0_i32_0 : i32, i32
  }
  func.func @transform_6(%arg0: i32) -> (i32, i32) {
    %c0_i32 = arith.constant 0 : i32
    %c0_i32_0 = arith.constant 0 : i32
    %c0_i32_1 = arith.constant 0 : i32
    return %c0_i32, %c0_i32_0 : i32, i32
  }
  func.func @transform_7(%arg0: i32) -> (i32, i32) {
    %c0_i32 = arith.constant 0 : i32
    %c0_i32_0 = arith.constant 0 : i32
    return %c0_i32, %arg0 : i32, i32
  }
}

</mosaic_0001>

<bundles_post_ra>
// kernel: qnetwork_basic_forward.1
= control target key start
LH: loop header
LB: loop body
LE: loop exit
PB: predicated region body
PF: predicated region fallthrough
CT: control target
= control target key end

     0   :  { %s680_s0 = inlined_call_operand.vmem [shape: f32[2,15], index: 0, kind: input, shape index: {}]   ;;  %s681_s1 = inlined_call_operand.vmem [shape: f32[15,32], index: 1, kind: input, shape index: {}]   ;;  %s682_s2 = inlined_call_operand.vmem [shape: f32[32,1], index: 2, kind: input, shape index: {}]   ;;  %s683_s3 = inlined_call_operand.vmem [shape: f32[32,32], index: 3, kind: input, shape index: {}]   ;;  %s684_s4 = inlined_call_operand.vmem [shape: f32[32,1], index: 4, kind: input, shape index: {}]   ;;  %s685_s5 = inlined_call_operand.vmem [shape: f32[1,32], index: 5, kind: input, shape index: {}]   ;;  %s686_s6 = inlined_call_operand.<no memory space> [shape: f32[1,1], index: 6, kind: input, shape index: {}]   ;;  %s687_s7 = inlined_call_operand.hbm [shape: f32[1,2], index: 7, kind: output, shape index: {}]  }
   0x1   :  { %v12_v0 = vstv %s686_s6 }
   0x2   :  { %13 = vst [vmem:[#allocation2] sm:$0x1] %v12_v0 }
   0x3   :  { %v29_v1 = vld [vmem:[%s681_s1] sm:$0xff]  ;;  %v561_v3 = vmov 0   ;;  %vm88_vm0 = vcmask 121856   ;;  %v30_v5 = vld [vmem:[%s681_s1 + $0x8] sm:$0x7f] }
   0x4   :  { %v32_v2 = vld [vmem:[%s682_s2] sm:$0xff]  ;;  %56 = vxpose.xlu0.b32.start [1/2] (short) (narrow) %v29_v1, 32  ;;  %535 = vset.pattern.permute.xlu1 %v561_v3 }
   0x5   :  { %v31_v4 = vld [vmem:[%s680_s0] sm:$0x3]  ;;  %38 = vperm.xlu1 %535, %v32_v2  }
   0x6   :  { %483 = vmatprep.subr.msk.mxu0 %vm88_vm0, %v31_v4 }
   0x7   :  { %14 = vsyncpa [#allocation4], 0  ;;  %v33_v6 = vld [vmem:[%s682_s2 + $0x8] sm:$0xff]  ;;  %484 = vmatpush3.xpose.msk.msra.mxu0 %vm88_vm0, %v31_v4  ;;  %v35_v7 = vld [vmem:[%s682_s2 + $0x18] sm:$0xff]  ;;  %vm253_vm1 = vcmask 261120   ;;  %v562_v44 = vmov 0.0|0.0   ;;  %v362_v1 = vlaneseq }
   0x8   :  { %57 = vxpose.xlu0.b32.end [2/2] (short) (narrow) %v30_v5, 32  ;;  %v193_v8 = vld [vmem:[%s683_s3] sm:$0xff]  ;;  %v34_v9 = vld [vmem:[%s682_s2 + $0x10] sm:$0xff]  ;;  %v194_v10 = vld [vmem:[%s683_s3 + $0x8] sm:$0xff]  ;;  %524 = vmatprep.subr.bf16.mxu0 %v562_v44  ;;  %vm563_vm2 = vmmov 0   ;;  %v564_v45 = vmov 0.0  }
   0x9   :  { %43 = vperm.xlu1 %535, %v33_v6   ;;  %v197_v11 = vld [vmem:[%s684_s4] sm:$0xff]  ;;  %v195_v12 = vld [vmem:[%s683_s3 + $0x10] sm:$0xff]  ;;  %v198_v13 = vld [vmem:[%s684_s4 + $0x8] sm:$0xff]  ;;  %v363_v2 = vshrl.u32 %v362_v1, 7  ;;  %s565_s29 = smov [#allocation3]   ;;  %vm439_vm3 = vcmask 8192  }
   0xa   :  { %v196_v14 = vld [vmem:[%s683_s3 + $0x18] sm:$0xff]  ;;  %v199_v15 = vld [vmem:[%s684_s4 + $0x10] sm:$0xff]  ;;  %v356_v16 = vld [vmem:[#allocation2] sm:$0x1]  ;;  %s447_s30 = sshll.u32 %s565_s29, 4  ;;  %s448_s30 = int_to_ptr.vmem [resolvable:$true] %s447_s30 }
   0xb   :  { %v200_v17 = vld [vmem:[%s684_s4 + $0x18] sm:$0xff]  ;;  %v355_v0 = vld [vmem:[%s685_s5] sm:$0x1]  ;;  %s537_s8 = scalar_lea.vmem %s448_s30, 16  ;;  %s541_s9 = scalar_lea.vmem %s448_s30, 32 }
   0xc   :  { %p538_p0 = scmp.ne.s32.totalorder %s448_s30, %s537_s8  ;;  %p542_p1 = scmp.lt.s32.totalorder %s448_s30, %s448_s30 }
   0xd   :  { %53 = vperm.xlu1 %535, %v35_v7   ;;  %p543_p2 = scmp.lt.s32.totalorder %s541_s9, %s537_s8 }
   0xf   :  { %p544_p3 = por %p543_p2, %p542_p1 }
  0x11   :  { %p545_p4 = pnand %p544_p3, %p538_p0 }
  0x31   :  { %536 = vset.pattern.permute.xlu0 %v561_v3  ;;  %v364_v3 = vsub.s32 0, %v363_v2 }
  0x36   :  { %221 = vxpose.xlu1.b32.start [1/4] (short) (narrow) %v193_v8, 32 }
  0x39   :  { %48 = vperm.xlu0 %536, %v34_v9  }
  0x3a   :  { %222 = vxpose.xlu1.b32.cont [2/4] (short) (narrow) %v194_v10, 32 }
  0x3d   :  { %203 = vperm.xlu0 %536, %v197_v11  }
  0x3e   :  { %223 = vxpose.xlu1.b32.cont [3/4] (short) (narrow) %v195_v12, 32 }
  0x41   :  { %208 = vperm.xlu0 %536, %v198_v13  }
  0x42   :  { %224 = vxpose.xlu1.b32.end [4/4] (short) (narrow) %v196_v14, 32 }
  0x45   :  { %213 = vperm.xlu0 %536, %v199_v15  }
  0x49   :  { %359 = vperm.xlu0 %536, %v356_v16  }
  0x60   :  { %218 = vperm.xlu1 %535, %v200_v17  }
  0x84   :  { %v72_v18 = vpop.trf.xlu0  ;;  %v39_v22 = vpop.permute.xlu1 %38 }
  0x85   :  { %485 = vmatprep.mubr.msk.f32.mxu0 %vm88_vm0, %v72_v18 }
  0x88   :  { %v73_v19 = vpop.trf.xlu0  ;;  %v44_v23 = vpop.permute.xlu1 %43 }
  0x89   :  { %486 = vmatmul.mubr.msk.f32.vlgmr.msra.gmra.mrb[0].mxu0 %vm88_vm0, %v73_v19 }
  0x8c   :  { %v74_v20 = vpop.trf.xlu0  ;;  %v54_v24 = vpop.permute.xlu1 %53 }
  0x8d   :  { %488 = vmatprep.mubr.msk.f32.mxu0 %vm88_vm0, %v74_v20 }
  0x90   :  { %v75_v21 = vpop.trf.xlu0 }
  0x91   :  { %489 = vmatmul.mubr.msk.f32.gmra.mrb[2].mxu0 %vm88_vm0, %v75_v21 }
  0x92   :  { %513 = vmatprep.mubr.msk.f32.mxu0 %vm563_vm2, %v564_v45 }
  0xb6   :  { %v237_v25 = vpop.trf.xlu1 }
  0xb7   :  { %499 = vmatprep.mubr.msk.f32.mxu1 %vm253_vm1, %v237_v25 }
  0xb8   :  { %v49_v34 = vpop.permute.xlu0 %48 }
  0xba   :  { %v238_v38 = vpop.trf.xlu1 }
  0xbc   :  { %v204_v46 = vpop.permute.xlu0 %203 }
  0xbe   :  { %v239_v42 = vpop.trf.xlu1 }
  0xc0   :  { %v209_v47 = vpop.permute.xlu0 %208 }
  0xc2   :  { %v240_v43 = vpop.trf.xlu1 }
  0xc4   :  { %v214_v56 = vpop.permute.xlu0 %213 }
  0xc8   :  { %v360_v4 = vpop.permute.xlu0 %359 }
  0xc9   :  { %v365_v5 = vrot.slane %v360_v4, %v364_v3 }
  0xdf   :  { %v219_v53 = vpop.permute.xlu1 %218 }
 0x15c   :  { %v487_v26 = vpop.f32.mrb[0].mxu0 }
 0x15d   :  { %v176_v27 = vadd.f32 %v487_v26, %v44_v23  ;;  %v170_v28 = vpop.f32.mrb[1].mxu0 }
 0x15e   :  { %v171_v29 = vadd.f32 %v170_v28, %v39_v22 }
 0x15f   :  { %v190_v30 = vmax.f32 %v176_v27, 0.0 }
 0x160   :  { %v189_v31 = vmax.f32 %v171_v29, 0.0 }
 0x162   :  { %v516_v32 = vpack.c.bf16 %v190_v30, %v189_v31 }
 0x164   :  { %v490_v33 = vpop.f32.mrb[2].mxu0  ;;  %517 = vmatprep.subr.bf16.mxu1 %v516_v32 }
 0x165   :  { %v186_v35 = vadd.f32 %v490_v33, %v54_v24  ;;  %v180_v36 = vpop.f32.mrb[3].mxu0  ;;  %519 = vmatpush3.bf16.msra.mxu1 %v516_v32 }
 0x166   :  { %v181_v37 = vadd.f32 %v180_v36, %v49_v34 }
 0x167   :  { %v192_v39 = vmax.f32 %v186_v35, 0.0 }
 0x168   :  { %v191_v40 = vmax.f32 %v181_v37, 0.0 }
 0x16a   :  { %v520_v41 = vpack.c.bf16 %v192_v39, %v191_v40 }
 0x16c   :  { %521 = vmatprep.subr.bf16.mxu1 %v520_v41 }
 0x16d   :  { %523 = vmatpush3.bf16.msra.mxu1 %v520_v41 }
 0x170   :  { %500 = vmatmul.mubr.msk.f32.vlgmr.msra.gmra.mrb[0].mxu1 %vm253_vm1, %v238_v38 }
 0x171   :  { %502 = vmatprep.mubr.msk.f32.mxu1 %vm253_vm1, %v239_v42 }
 0x174   :  { %503 = vmatmul.mubr.msk.f32.gmra.mrb[2].mxu1 %vm253_vm1, %v240_v43 }
 0x243   :  { %v501_v48 = vpop.f32.mrb[0].mxu1 }
 0x244   :  { %v338_v49 = vadd.f32 %v501_v48, %v209_v47  ;;  %v332_v50 = vpop.f32.mrb[1].mxu1 }
 0x245   :  { %v333_v51 = vadd.f32 %v332_v50, %v204_v46 }
 0x246   :  { %v352_v52 = vmax.f32 %v338_v49, 0.0 }
 0x247   :  { %v351_v54 = vmax.f32 %v333_v51, 0.0  ;;  %v504_v55 = vpop.f32.mrb[2].mxu1 }
 0x248   :  { %v348_v57 = vadd.f32 %v504_v55, %v219_v53  ;;  %v342_v58 = vpop.f32.mrb[3].mxu1 }
 0x249   :  { %v525_v59 = vpack.c.bf16 %v352_v52, %v351_v54  ;;  %v343_v60 = vadd.f32 %v342_v58, %v214_v56 }
 0x24a   :  { %v354_v61 = vmax.f32 %v348_v57, 0.0 }
 0x24b   :  { %v353_v62 = vmax.f32 %v343_v60, 0.0  ;;  %526 = vmatpush3.bf16.msra.mxu0 %v525_v59 }
 0x24c   :  { %527 = vmatprep.subr.bf16.mxu0 %v562_v44 }
 0x24d   :  { %v528_v63 = vpack.c.bf16 %v354_v61, %v353_v62 }
 0x24f   :  { %529 = vmatpush3.bf16.msra.mxu0 %v528_v63 }
 0x252   :  { %514 = vmatmul.mubr.msk.f32.vlgmr.msra.gmra.mrb[4].mxu0 %vm253_vm1, %v355_v0 }
 0x325   :  { %v435_v6 = vpop.f32.mrb[4].mxu0 }
 0x326   :  { %v436_v7 = vadd.f32 %v435_v6, %v365_v5  ;;  %v515_v8 = vpop.f32.mrb[5].mxu0 }
 0x328   :  { %440 = vst.msk [vmem:[#allocation3] sm:$0x1] %vm439_vm3, %v436_v7 }
 0x329   :  { %548 = shalt.err (!%p545_p4)
}
 0x32a   :  { %s549_s6 = scalar_lea.hbm %s687_s7, 16 }
 0x32b   :  { %p550_p5 = scmp.ne.s32.totalorder %s687_s7, %s549_s6  ;;  %p553_p6 = scmp.lt.u32.totalorder %s549_s6, %s687_s7 }
 0x32d   :  { %p555_p7 = pnand %p553_p6, %p550_p5 }
 0x32f   :  { %558 = shalt.err (!%p555_p7)
}
 0x330   :  { %450 = dma.vmem_to_hbm [thread:$0]  %s448_s30, 16, %s687_s7, [#allocation4]  }
 0x331   :  { %559 = dma.done.wait [#allocation4], 16  }
 0x332   :  { %560 = vsyncadd [#allocation4], 4294967280 }
 0x333   :  { %454 = vsyncpa [#allocation4], 1 }

</bundles_post_ra>
